<compile_context>
chip_gen: v7x
topology: tpu7x:2x2x1
jax: 0.10.0
libtpu: 0.0.40
codegen_flags: <defaults>
</compile_context>

<pallas_src>
from functools import partial

import jax
import jax.numpy as jnp
from jax import lax
from jax.experimental import pallas as pl
from jax.experimental.pallas import tpu as pltpu


# ----------------------------------------------------------------------------
# Kernel 1: GroupNorm apply + QKV 1x1 conv (tiled over spatial rows)
# ----------------------------------------------------------------------------
def norm_qkv_kernel(x_ref, scale_ref, shift_ref, w_ref, b_ref, *out_refs, C):
    x = x_ref[0].astype(jnp.float32)                        # (thw, C)
    xn = x * scale_ref[0] + shift_ref[0]                    # GroupNorm affine (stats hoisted)
    # Attention scale already folded into the q-rows of w/b; f32 accumulation on the MXU.
    qkv = jnp.dot(xn.astype(w_ref.dtype), w_ref[...],
                  preferred_element_type=jnp.float32) + b_ref[...]     # (thw, 3C)
    if len(out_refs) == 1:                                  # packed (thw, 3C): one lane-dense store
        out_refs[0][0] = qkv.astype(out_refs[0].dtype)
    else:                                                   # fallback for C not 128-aligned
        q_ref, k_ref, v_ref = out_refs
        q_ref[0] = qkv[:, :C].astype(q_ref.dtype)
        k_ref[0] = qkv[:, C:2 * C].astype(k_ref.dtype)
        v_ref[0] = qkv[:, 2 * C:].astype(v_ref.dtype)


# ----------------------------------------------------------------------------
# Kernel 2: flash attention (online softmax over KV tiles) + residual + out conv
#           K/V blocks are the full (HW, C) slab -> DMA'd once per batch.
# ----------------------------------------------------------------------------
def flash_attn_out_kernel(q_ref, k_ref, v_ref, res_ref, w_ref, b_ref, o_ref,
                          m_sc, l_sc, acc_sc, *, num_heads, tk_size, recip_approx):
    ki = pl.program_id(2)
    nk = pl.num_programs(2)
    C = acc_sc.shape[-1]
    hc = C // num_heads
    koff = pl.multiple_of(ki * tk_size, tk_size)            # aligned offset into resident K/V

    @pl.when(ki == 0)
    def _():
        m_sc[...] = jnp.full_like(m_sc, -jnp.inf)
        l_sc[...] = jnp.zeros_like(l_sc)
        acc_sc[...] = jnp.zeros_like(acc_sc)

    # Static unroll over heads: heads occupy disjoint channel (lane) slices — lane-aligned at
    # real-model sizes (hc=128).  Static slices are required for sub-128 hc; per-head s/p
    # intermediates are consumed immediately by the PV matmul / acc update, so liveness does
    # not stack across heads at tq=tk=512.
    for h in range(num_heads):
        sl = slice(h * hc, (h + 1) * hc)
        q_h = q_ref[0, :, sl]                               # (tq, hc), pre-scaled via folded W
        k_h = k_ref[0, pl.ds(koff, tk_size), sl]            # (tk, hc), stored layout (no .T)
        s = lax.dot_general(q_h, k_h,
                            dimension_numbers=(((1,), (1,)), ((), ())),
                            preferred_element_type=jnp.float32)        # (tq, tk) f32
        m_prev = m_sc[:, h:h + 1]
        m_new = jnp.maximum(m_prev, jnp.max(s, axis=-1, keepdims=True))
        alpha = jnp.exp(m_prev - m_new)
        p = jnp.exp(s - m_new)                              # softmax math in f32
        l_sc[:, h:h + 1] = alpha * l_sc[:, h:h + 1] + jnp.sum(p, axis=-1, keepdims=True)
        v_h = v_ref[0, pl.ds(koff, tk_size), sl]            # (tk, hc)
        acc_sc[:, sl] = alpha * acc_sc[:, sl] + jnp.dot(
            p.astype(v_h.dtype), v_h, preferred_element_type=jnp.float32)
        m_sc[:, h:h + 1] = m_new

    @pl.when(ki == nk - 1)
    def _():
        # Deferred softmax normalization on the EUP; build y as register values
        # (no acc_sc store + reload), then residual add + 1x1 output conv.
        inv = pl.reciprocal(l_sc[...], approx=recip_approx)            # (tq, nh)
        parts = [acc_sc[:, h * hc:(h + 1) * hc] * inv[:, h:h + 1]
                 for h in range(num_heads)]
        y = jnp.concatenate(parts, axis=-1) + res_ref[0].astype(jnp.float32)
        out = jnp.dot(y.astype(w_ref.dtype), w_ref[...],
                      preferred_element_type=jnp.float32) + b_ref[...]
        o_ref[0] = out.astype(o_ref.dtype)


# ----------------------------------------------------------------------------
# Helpers
# ----------------------------------------------------------------------------
def _pick_tile(n, target):
    """Largest divisor of n <= target, preferring 256- then 128- then 8-aligned tiles."""
    if n <= target:
        return n
    for align in (256, 128, 8):
        t = (target // align) * align
        while t >= align:
            if n % t == 0:
                return t
            t -= align
    # TODO(synk): pad HW to a 128-multiple instead of falling back to odd feature-map sizes.
    return n


def _vmem_limit_bytes(requested):
    """Per-chip VMEM budget: <= 3/4 of physical VMEM (v7x: ~48 MiB, v5e/v6e: ~96 MiB)."""
    cap = 64 << 20
    try:
        info = pltpu.get_tpu_info()
        cap = int(getattr(info, "vmem_capacity_bytes", cap) or cap)
    except Exception:
        pass
    return int(min(int(cap * 3 // 4), max(32 << 20, int(requested))))


# ----------------------------------------------------------------------------
# Wrapper
# ----------------------------------------------------------------------------
def vattention_block(x_nchw, params, *, num_heads=4, num_groups=32, eps=1e-5,
                     q_tile=512, kv_tile=512, compute_dtype=jnp.bfloat16):
    B, C, H, W = x_nchw.shape
    HW = H * W
    assert C % num_heads == 0 and C % num_groups == 0
    hc = C // num_heads
    cg = C // num_groups
    in_dtype = x_nchw.dtype
    cd = jnp.dtype(compute_dtype).itemsize
    od = jnp.dtype(in_dtype).itemsize

    # NCHW -> (B, HW, C): channels on the lane axis, 1x1 convs become matmuls.
    x = jnp.transpose(x_nchw, (0, 2, 3, 1)).reshape(B, HW, C)

    # ---- GroupNorm statistics: one fused sum / sum-of-squares reduction (f32 accumulation),
    #      no materialized f32 copy of x. ----
    xg = x.reshape(B, HW, num_groups, cg)
    n_per_group = HW * cg
    s1 = jnp.sum(xg, axis=(1, 3), dtype=jnp.float32)                     # (B, G)
    s2 = jnp.sum(jnp.square(xg.astype(jnp.float32)), axis=(1, 3))        # (B, G)
    mean_g = s1 / n_per_group
    var_g = jnp.maximum(s2 / n_per_group - jnp.square(mean_g), 0.0)
    inv_g = lax.rsqrt(var_g + eps)
    gamma = params["gamma"].astype(jnp.float32)
    beta = params["beta"].astype(jnp.float32)
    scale_c = jnp.repeat(inv_g, cg, axis=1) * gamma[None, :]             # (B, C)
    shift_c = beta[None, :] - jnp.repeat(mean_g, cg, axis=1) * scale_c   # (B, C)
    scale_c = scale_c.reshape(B, 1, C)
    shift_c = shift_c.reshape(B, 1, C)

    # Fold 1/sqrt(head_dim) into the q rows of the QKV weight/bias (one-time, host-side).
    attn_scale = float(hc) ** -0.5
    qfold = jnp.concatenate([jnp.full((C,), attn_scale, jnp.float32),
                             jnp.ones((2 * C,), jnp.float32)])
    wqkv_t = (params["w_qkv"].astype(jnp.float32).T * qfold[None, :]).astype(compute_dtype)  # (C,3C)
    bqkv = (params["b_qkv"].astype(jnp.float32) * qfold).reshape(1, 3 * C)
    wout_t = params["w_out"].T.astype(compute_dtype)                     # (C, C)
    bout = params["b_out"].astype(jnp.float32).reshape(1, C)

    thw = _pick_tile(HW, q_tile)
    tq = _pick_tile(HW, q_tile)
    tk = _pick_tile(HW, kv_tile)
    recip_approx = bool(jnp.dtype(compute_dtype) == jnp.dtype(jnp.bfloat16))

    # Packed (B, HW, 3C) QKV needs C-sized, 128-aligned channel blocks in kernel 2.
    packed = (C % 128 == 0)

    # ------------------- Kernel 1: norm + QKV projection -----------------------
    if packed:
        out_shape1 = jax.ShapeDtypeStruct((B, HW, 3 * C), compute_dtype)
        out_specs1 = pl.BlockSpec((1, thw, 3 * C), lambda b, i: (b, i, 0))
    else:
        out_shape1 = tuple(jax.ShapeDtypeStruct((B, HW, C), compute_dtype) for _ in range(3))
        out_specs1 = [pl.BlockSpec((1, thw, C), lambda b, i: (b, i, 0))] * 3

    vmem1 = (2 * (thw * C * 4 + 3 * thw * C * cd)
             + 2 * (3 * C * C * cd + 3 * C * 4 + 2 * C * 4) + (8 << 20))
    k1_call = pl.pallas_call(
        partial(norm_qkv_kernel, C=C),
        out_shape=out_shape1,
        grid_spec=pltpu.PrefetchScalarGridSpec(
            num_scalar_prefetch=0,
            grid=(B, HW // thw),
            in_specs=[
                pl.BlockSpec((1, thw, C), lambda b, i: (b, i, 0)),       # x tile
                pl.BlockSpec((1, 1, C), lambda b, i: (b, 0, 0)),         # per-(b,c) scale
                pl.BlockSpec((1, 1, C), lambda b, i: (b, 0, 0)),         # per-(b,c) shift
                # TODO(synk): pipeline_mode=pl.Buffered(1) on these constant-index weight/bias
                # blocks would reclaim their second buffer on v7x's 64 MiB VMEM.
                pl.BlockSpec((C, 3 * C), lambda b, i: (0, 0)),           # w_qkv^T (scale-folded)
                pl.BlockSpec((1, 3 * C), lambda b, i: (0, 0)),           # b_qkv  (scale-folded)
            ],
            out_specs=out_specs1,
        ),
        compiler_params=pltpu.CompilerParams(
            dimension_semantics=("parallel", "parallel"),
            vmem_limit_bytes=_vmem_limit_bytes(vmem1)),
        cost_estimate=pl.CostEstimate(
            flops=2 * B * HW * C * 3 * C,
            transcendentals=0,
            bytes_accessed=B * HW * C * 4 + B * HW * 3 * C * cd + 3 * C * C * cd),
    )

    if packed:
        qkv = k1_call(x, scale_c, shift_c, wqkv_t, bqkv)
        q_arr = k_arr = v_arr = qkv
        q_spec = pl.BlockSpec((1, tq, C), lambda b, qi, ki: (b, qi, 0))
        k_spec = pl.BlockSpec((1, HW, C), lambda b, qi, ki: (b, 0, 1))   # full-HW, resident
        v_spec = pl.BlockSpec((1, HW, C), lambda b, qi, ki: (b, 0, 2))   # full-HW, resident
    else:
        q_arr, k_arr, v_arr = k1_call(x, scale_c, shift_c, wqkv_t, bqkv)
        q_spec = pl.BlockSpec((1, tq, C), lambda b, qi, ki: (b, qi, 0))
        k_spec = pl.BlockSpec((1, HW, C), lambda b, qi, ki: (b, 0, 0))   # full-HW, resident
        v_spec = pl.BlockSpec((1, HW, C), lambda b, qi, ki: (b, 0, 0))   # full-HW, resident

    # ----------- Kernel 2: flash attention + residual + output conv ------------
    # NOTE (v7x): the parallel extent is B * (HW // tq); keep it >= 2 so both TCs get work.
    vmem2 = (2 * tq * C * cd                 # q tile (double-buffered)
             + 2 * 2 * HW * C * cd           # resident K + V
             + 2 * tq * C * 4                # residual tile
             + 2 * (C * C * cd + C * 4)      # w_out, b_out
             + 2 * tq * C * od               # output tile
             + tq * C * 4                    # acc scratch
             + 2 * tq * tk * 4               # s/p intermediates
             + (8 << 20))
    out = pl.pallas_call(
        partial(flash_attn_out_kernel, num_heads=num_heads, tk_size=tk,
                recip_approx=recip_approx),
        out_shape=jax.ShapeDtypeStruct((B, HW, C), in_dtype),
        grid_spec=pltpu.PrefetchScalarGridSpec(
            num_scalar_prefetch=0,
            grid=(B, HW // tq, HW // tk),
            in_specs=[
                q_spec, k_spec, v_spec,
                pl.BlockSpec((1, tq, C), lambda b, qi, ki: (b, qi, 0)),  # residual x
                pl.BlockSpec((C, C), lambda b, qi, ki: (0, 0)),          # w_out^T
                pl.BlockSpec((1, C), lambda b, qi, ki: (0, 0)),          # b_out
            ],
            out_specs=pl.BlockSpec((1, tq, C), lambda b, qi, ki: (b, qi, 0)),
            scratch_shapes=[
                pltpu.VMEM((tq, num_heads), jnp.float32),                # running max m
                pltpu.VMEM((tq, num_heads), jnp.float32),                # running sum l
                pltpu.VMEM((tq, C), jnp.float32),                        # unnormalized acc
            ],
        ),
        compiler_params=pltpu.CompilerParams(
            dimension_semantics=("parallel", "parallel", "arbitrary"),
            vmem_limit_bytes=_vmem_limit_bytes(vmem2)),
        cost_estimate=pl.CostEstimate(
            flops=4 * B * HW * HW * C + 2 * B * HW * C * C,
            transcendentals=B * num_heads * HW * HW,
            # K/V are read once per batch now (resident), q/res/out once per element.
            bytes_accessed=B * HW * C * (3 * cd + 4 + od) + C * C * cd),
    )(q_arr, k_arr, v_arr, x, wout_t, bout)

    # (B, HW, C) -> NCHW
    return jnp.transpose(out.reshape(B, H, W, C), (0, 3, 1, 2))


# ----------------------------------------------------------------------------
# Pure-JAX reference mirroring the PyTorch forward (NCHW), for verification.
# ----------------------------------------------------------------------------
def reference_forward(x, params, *, num_heads, num_groups, eps=1e-5):
    P = lax.Precision.HIGHEST
    B, C, H, W = x.shape
    hc = C // num_heads
    xg = x.reshape(B, num_groups, C // num_groups, H, W)
    mean = xg.mean(axis=(2, 3, 4), keepdims=True)
    var = xg.var(axis=(2, 3, 4), keepdims=True)             # biased, like torch GroupNorm
    xn = ((xg - mean) / jnp.sqrt(var + eps)).reshape(B, C, H, W)
    xn = xn * params["gamma"][None, :, None, None] + params["beta"][None, :, None, None]
    qkv = jnp.einsum("bchw,oc->bohw", xn, params["w_qkv"], precision=P) \
        + params["b_qkv"][None, :, None, None]
    q, k, v = jnp.split(qkv, 3, axis=1)

    def rsh(t):
        return t.reshape(B, num_heads, hc, H * W).transpose(0, 1, 3, 2).reshape(
            B * num_heads, H * W, hc)

    q, k, v = map(rsh, (q, k, v))
    scale = hc ** (-0.5)
    attn = jax.nn.softmax(jnp.einsum("bqd,bkd->bqk", q, k, precision=P) * scale, axis=-1)
    o = jnp.einsum("bqk,bkd->bqd", attn, v, precision=P)
    o = o.reshape(B, num_heads, H * W, hc).transpose(0, 1, 3, 2).reshape(B, C, H, W)
    o = o + x
    return jnp.einsum("bchw,oc->bohw", o, params["w_out"], precision=P) \
        + params["b_out"][None, :, None, None]


def init_params(key, in_channels):
    C = in_channels
    ks = jax.random.split(key, 4)
    std = 1.0 / jnp.sqrt(jnp.float32(C))
    return {
        "gamma": jnp.ones((C,), jnp.float32),
        "beta": jnp.zeros((C,), jnp.float32),
        "w_qkv": jax.random.normal(ks[0], (3 * C, C), jnp.float32) * std,   # conv (3C,C,1,1) squeezed
        "b_qkv": jax.random.normal(ks[1], (3 * C,), jnp.float32) * 0.01,
        "w_out": jax.random.normal(ks[2], (C, C), jnp.float32) * std,       # conv (C,C,1,1) squeezed
        "b_out": jax.random.normal(ks[3], (C,), jnp.float32) * 0.01,
    }


def _rel_err(a, b):
    a = jnp.asarray(a, jnp.float32).ravel()
    b = jnp.asarray(b, jnp.float32).ravel()
    return float(jnp.linalg.norm(a - b) / (jnp.linalg.norm(b) + 1e-12))


if __name__ == "__main__":
    key = jax.random.PRNGKey(0)
    kx1, kp1, kx2, kp2 = jax.random.split(key, 4)
    num_heads, num_groups = 4, 32

    # Config A: lane-aligned channels (C=128, hc=32) -> packed-QKV fast path.
    B, C, H, W = 2, 128, 16, 16
    x = jax.random.normal(kx1, (B, C, H, W), jnp.float32)
    params = init_params(kp1, C)
    ref = reference_forward(x, params, num_heads=num_heads, num_groups=num_groups)

    out_f32 = jax.block_until_ready(vattention_block(
        x, params, num_heads=num_heads, num_groups=num_groups, compute_dtype=jnp.float32))
    assert out_f32.shape == (B, C, H, W)
    e32 = _rel_err(out_f32, ref)
    assert e32 < 2e-2, f"f32 path rel L2 err {e32}"

    out_bf16 = jax.block_until_ready(vattention_block(
        x, params, num_heads=num_heads, num_groups=num_groups, compute_dtype=jnp.bfloat16))
    ebf = _rel_err(out_bf16, ref)
    assert ebf < 6e-2, f"bf16 path rel L2 err {ebf}"

    # Config B: C=64 (not 128-aligned) -> separate q/k/v output fallback, f32 check.
    B2, C2, H2, W2 = 2, 64, 8, 8
    x2 = jax.random.normal(kx2, (B2, C2, H2, W2), jnp.float32)
    params2 = init_params(kp2, C2)
    ref2 = reference_forward(x2, params2, num_heads=num_heads, num_groups=num_groups)
    out2 = jax.block_until_ready(vattention_block(
        x2, params2, num_heads=num_heads, num_groups=num_groups, compute_dtype=jnp.float32))
    e2 = _rel_err(out2, ref2)
    assert e2 < 2e-2, f"fallback path rel L2 err {e2}"

    print("KERNEL_OK")
</pallas_src>

<mosaic_0001>
module attributes {stable_mosaic.version = 11 : i64} {
  func.func @norm_qkv_kernel(%arg0: i32, %arg1: i32, %arg2: memref<1x256x128xf32, #tpu.memory_space<vmem>>, %arg3: memref<1x1x128xf32, #tpu.memory_space<vmem>>, %arg4: memref<1x1x128xf32, #tpu.memory_space<vmem>>, %arg5: memref<128x384xf32, #tpu.memory_space<vmem>>, %arg6: memref<1x384xf32, #tpu.memory_space<vmem>>, %arg7: memref<1x256x384xf32, #tpu.memory_space<vmem>>) attributes {dimension_semantics = [#tpu.dimension_semantics<parallel>, #tpu.dimension_semantics<parallel>], iteration_bounds = array<i64: 2, 1>, scalar_prefetch = 0 : i64, scratch_operands = 0 : i64, tpu.core_type = #tpu.core_type<tc>, window_params = [{transform_indices = @transform_0, window_bounds = array<i64: 1, 256, 128>}, {transform_indices = @transform_1, window_bounds = array<i64: 1, 1, 128>}, {transform_indices = @transform_2, window_bounds = array<i64: 1, 1, 128>}, {pipeline_mode = #tpu.pipeline_mode<synchronous>, transform_indices = @transform_3, window_bounds = array<i64: 128, 384>}, {pipeline_mode = #tpu.pipeline_mode<synchronous>, transform_indices = @transform_4, window_bounds = array<i64: 1, 384>}, {transform_indices = @transform_5, window_bounds = array<i64: 1, 256, 384>}]} {
    %c0 = arith.constant 0 : index
    %c0_0 = arith.constant 0 : index
    %c0_1 = arith.constant 0 : index
    %0 = vector.load %arg2[%c0, %c0_0, %c0_1] : memref<1x256x128xf32, #tpu.memory_space<vmem>>, vector<1x256x128xf32>
    %1 = vector.shape_cast %0 : vector<1x256x128xf32> to vector<256x128xf32>
    %c0_2 = arith.constant 0 : index
    %c0_3 = arith.constant 0 : index
    %c0_4 = arith.constant 0 : index
    %2 = vector.load %arg3[%c0_2, %c0_3, %c0_4] : memref<1x1x128xf32, #tpu.memory_space<vmem>>, vector<1x1x128xf32>
    %3 = vector.shape_cast %2 : vector<1x1x128xf32> to vector<1x128xf32>
    %4 = vector.broadcast %3 : vector<1x128xf32> to vector<256x128xf32>
    %5 = arith.mulf %1, %4 : vector<256x128xf32>
    %c0_5 = arith.constant 0 : index
    %c0_6 = arith.constant 0 : index
    %c0_7 = arith.constant 0 : index
    %6 = vector.load %arg4[%c0_5, %c0_6, %c0_7] : memref<1x1x128xf32, #tpu.memory_space<vmem>>, vector<1x1x128xf32>
    %7 = vector.shape_cast %6 : vector<1x1x128xf32> to vector<1x128xf32>
    %8 = vector.broadcast %7 : vector<1x128xf32> to vector<256x128xf32>
    %9 = arith.addf %5, %8 : vector<256x128xf32>
    %c0_8 = arith.constant 0 : index
    %c0_9 = arith.constant 0 : index
    %10 = vector.load %arg5[%c0_8, %c0_9] : memref<128x384xf32, #tpu.memory_space<vmem>>, vector<128x384xf32>
    %cst = arith.constant dense<0.000000e+00> : vector<256x384xf32>
    %11 = tpu.matmul %9, %10, %cst {dimension_numbers = #tpu.dot_dimension_numbers<[1], [0], [0], [1], [0, 0, 1, 1], [], []>} : vector<256x128xf32>, vector<128x384xf32>, vector<256x384xf32> -> vector<256x384xf32>
    %c0_10 = arith.constant 0 : index
    %c0_11 = arith.constant 0 : index
    %12 = vector.load %arg6[%c0_10, %c0_11] : memref<1x384xf32, #tpu.memory_space<vmem>>, vector<1x384xf32>
    %13 = vector.broadcast %12 : vector<1x384xf32> to vector<256x384xf32>
    %14 = arith.addf %11, %13 : vector<256x384xf32>
    %c0_12 = arith.constant 0 : index
    %c0_13 = arith.constant 0 : index
    %c0_14 = arith.constant 0 : index
    %15 = vector.load %arg7[%c0_12, %c0_13, %c0_14] : memref<1x256x384xf32, #tpu.memory_space<vmem>>, vector<1x256x384xf32>
    %16 = vector.shape_cast %15 : vector<1x256x384xf32> to vector<256x384xf32>
    %17 = vector.shape_cast %14 : vector<256x384xf32> to vector<1x256x384xf32>
    tpu.vector_store %arg7[%c0_12, %c0_13, %c0_14], %17 {strides = array<i32>} : memref<1x256x384xf32, #tpu.memory_space<vmem>>, vector<1x256x384xf32>,
    return
  }
  func.func @transform_0(%arg0: i32, %arg1: i32) -> (i32, i32, i32) {
    %c0_i32 = arith.constant 0 : i32
    %c0_i32_0 = arith.constant 0 : i32
    return %arg0, %arg1, %c0_i32 : i32, i32, i32
  }
  func.func @transform_1(%arg0: i32, %arg1: i32) -> (i32, i32, i32) {
    %c0_i32 = arith.constant 0 : i32
    %c0_i32_0 = arith.constant 0 : i32
    %c0_i32_1 = arith.constant 0 : i32
    return %arg0, %c0_i32, %c0_i32_0 : i32, i32, i32
  }
  func.func @transform_2(%arg0: i32, %arg1: i32) -> (i32, i32, i32) {
    %c0_i32 = arith.constant 0 : i32
    %c0_i32_0 = arith.constant 0 : i32
    %c0_i32_1 = arith.constant 0 : i32
    return %arg0, %c0_i32, %c0_i32_0 : i32, i32, i32
  }
  func.func @transform_3(%arg0: i32, %arg1: i32) -> (i32, i32) {
    %c0_i32 = arith.constant 0 : i32
    %c0_i32_0 = arith.constant 0 : i32
    %c0_i32_1 = arith.constant 0 : i32
    return %c0_i32, %c0_i32_0 : i32, i32
  }
  func.func @transform_4(%arg0: i32, %arg1: i32) -> (i32, i32) {
    %c0_i32 = arith.constant 0 : i32
    %c0_i32_0 = arith.constant 0 : i32
    %c0_i32_1 = arith.constant 0 : i32
    return %c0_i32, %c0_i32_0 : i32, i32
  }
  func.func @transform_5(%arg0: i32, %arg1: i32) -> (i32, i32, i32) {
    %c0_i32 = arith.constant 0 : i32
    %c0_i32_0 = arith.constant 0 : i32
    return %arg0, %arg1, %c0_i32 : i32, i32, i32
  }
}

</mosaic_0001>

<bundles_post_ra>
// kernel: tpu_custom_call.1
= control target key start
LH: loop header
LB: loop body
LE: loop exit
PB: predicated region body
PF: predicated region fallthrough
CT: control target
= control target key end

     0   :  { %10 = vsyncpa [#allocation3], 0  ;;  %s2344_s0 = inlined_call_operand.hbm [shape: f32[2,256,128], index: 0, kind: input, shape index: {}]   ;;  %s2345_s1 = inlined_call_operand.vmem [shape: f32[2,1,128], index: 1, kind: input, shape index: {}]   ;;  %s2346_s2 = inlined_call_operand.vmem [shape: f32[2,1,128], index: 2, kind: input, shape index: {}]   ;;  %s2347_s3 = inlined_call_operand.hbm [shape: f32[128,384], index: 3, kind: input, shape index: {}]   ;;  %s2348_s4 = inlined_call_operand.vmem [shape: f32[1,384], index: 4, kind: input, shape index: {}]   ;;  %s2349_s5 = inlined_call_operand.hbm [shape: f32[2,256,384], index: 5, kind: output, shape index: {}]  }
   0x1   :  { %12 = vsyncpa [#allocation3 + $0x1], 0 }
   0x2   :  { %13 = vsyncpa [#allocation6], 0 }
   0x3   :  { %14 = vsyncpa [#allocation4], 0 }
   0x4   :  { %16 = vsyncpa [#allocation4 + $0x1], 0  ;;  %s1684_s18 = smov 0   ;;  %s1686_s19 = smov 0  }
   0x5   :  { %s1688_s20 = smov 0   ;;  %s1690_s21 = smov 0  }
   0x6   :  { %s1692_s22 = smov 0   ;;  %s1694_s23 = smov 0  }
   0x7 LB: > { %s1191_s24 = sadd.s32 4294967295, %s1642_s23   ;;  %s1192_s25 = sadd.s32 4294967294, %s1642_s23   ;;  %s1642_s23 = sphi %s1694_s23, %s22_s23   ;;  %s1638_s22 = sphi %s1692_s22, %s2373_s22   ;;  %s1634_s21 = sphi %s1690_s21, %s2372_s21   ;;  %s1630_s20 = sphi %s1688_s20, %s2371_s20   ;;  %s1626_s19 = sphi %s1686_s19, %s2370_s19   ;;  %s1622_s18 = sphi %s1684_s18, %s2369_s18  }
   0x8   : > { %p56_p0 = scmp.ne.s32.totalorder %s1626_s19, %s1622_s18  ;;  %p1718_p1 = scmp.eq.s32.totalorder %s1191_s24, 0 }
   0x9   : > { %p1722_p2 = scmp.eq.s32.totalorder %s1191_s24, 1  ;;  %p182_p3 = scmp.eq.s32.totalorder %s1192_s25, 1 }
   0xa   : > { %s2354_s26 = scalar_select %p1718_p1, 1, 0 }
   0xb   : > { %s2355_s27 = scalar_select %p1722_p2, 1, 0 }
   0xc   : > { %p1728_p4 = por %p1718_p1, %p56_p0  ;;  %p1193_p5 = scmp.ge.s32.totalorder %s1642_s23, 1 }
   0xd   : > { %p1733_p6 = por %p182_p3, %p56_p0  ;;  %p189_p7 = scmp.lt.s32.totalorder %s1642_s23, 3 }
   0xe   : > { %s2356_s28 = scalar_select %p1728_p4, 1, 0 }
   0xf   : > { %s2357_s29 = scalar_select %p1733_p6, 1, 0 }
  0x10   : > { %p1738_p8 = pnand %p1193_p5, %p189_p7  ;;  %s1644_s6 = smov [#allocation5]  }
  0x11   : > { %s201_s7 = sshll.u32 %s1644_s6, 4  ;;  %s34_s9 = sadd.s32 1, %s1638_s22  ;;  %s202_s7 = int_to_ptr.vmem [resolvable:$true] %s201_s7 }
  0x12   : > { %s2358_s30 = scalar_select %p1738_p8, 1, 0 }
  0x13   : > { %p1426_p9 = pneg %p1738_p8  ;;  %s1498_s12 = scalar_lea.hbm %s2347_s3, 6144 }
  0x14   : > { %p1499_p12 = scmp.ne.s32.totalorder %s2347_s3, %s1498_s12  ;;  %p1505_p5 = scmp.lt.u32.totalorder %s1498_s12, %s2347_s3 }
  0x15   : > { %p1747_p11 = pnand %p1426_p9, %p1718_p1 }
  0x17   : > { %p1500_p13 = pneg %p1747_p11 }
  0x19   : > { %p1501_p0 = pnand %p1500_p13, %p1499_p12 }
  0x1b   : > { %p1502_p3 = pneg %p1501_p0 }
  0x1d   : > { %p1507_p7 = pnand %p1505_p5, %p1502_p3 }
  0x1f   : > { %1510 = shalt.err (!%p1507_p7)
}
  0x20   : > { %s1511_s17 = scalar_lea.vmem %s202_s7, 6144  ;;  %p1519_p1 = scmp.lt.s32.totalorder %s202_s7, %s202_s7 }
  0x21   : > { %p1512_p9 = scmp.ne.s32.totalorder %s202_s7, %s1511_s17  ;;  %p1520_p4 = scmp.lt.s32.totalorder %s1511_s17, %s1511_s17 }
  0x23   : > { %p1514_p10 = pnand %p1512_p9, %p1500_p13  ;;  %p1521_p8 = por %p1520_p4, %p1519_p1 }
  0x25   : > { %p1515_p6 = pneg %p1514_p10 }
  0x27   : > { %p1522_p2 = pnand %p1521_p8, %p1515_p6 }
  0x29   : > { %1525 = shalt.err (!%p1522_p2)
}
  0x2a   : > { %s1645_s24 = smov 384   ;;  %s1646_s25 = smov 24  }
  0x2b   : > { %1429 = dma.hbm_to_vmem [thread:$0]  (!%p1747_p11), %s2347_s3, 6144, %s202_s7, [#allocation6], %s1645_s24, %s1645_s24, %s1646_s25  }
  0x2c   : > { %p36_p1 = scmp.ge.s32.totalorder %s34_s9, 2  ;;  %s43_s11 = sadd.s32 1, %s1630_s20 }
  0x2d   : > { %p50_p2 = scmp.ne.s32.totalorder %s1630_s20, %s1626_s19  ;;  %p51_p4 = scmp.eq.s32.totalorder %s1642_s23, 0 }
  0x2e   : > { %s2375_s9 = smov (%p36_p1, %s34_s9), 0  ;;  %p2361_p8 = scmp.ne.s32.totalorder %s2355_s27, 0 }
  0x2f   : > { %p1774_p6 = por %p51_p4, %p50_p2  ;;  %s38_s8 = ssub.s32 %s1638_s22, %s2375_s9 }
  0x30   : > { %p1780_p10 = por %p2361_p8, %p50_p2  ;;  %p1439_p12 = scmp.lt.s32.totalorder %s1642_s23, 2 }
  0x31   : > { %p41_p11 = scmp.eq.s32.totalorder %s38_s8, 0  ;;  %s218_s7 = sand.u32 1, %s1630_s20  }
  0x32   : > { %s1196_s14 = sshll.u32 %s218_s7, 8  ;;  %s1207_s16 = sshll.u32 %s1638_s22, 12 }
  0x33   : > { %s1789_s15 = scalar_select %p41_p11, %s1630_s20, %s43_s11  }
  0x34   : > { %s1795_s25 = scalar_lea.hbm %s2344_s0, %s1207_s16  ;;  %s222_s27 = scalar_lea.vmem [#allocation2], %s1196_s14 }
  0x35   : > { %s231_s6 = sshll.u32 %s222_s27, 4  ;;  %p1801_p13 = pnand %p1439_p12, %p1774_p6  ;;  %s1797_s6 = int_to_ptr.vmem [resolvable:$true] %s231_s6 }
  0x36   : > { %s1805_s11 = scalar_lea.sflag [#allocation3], %s218_s7  ;;  %s1526_s8 = scalar_lea.hbm %s1795_s25, 4096 }
  0x37   : > { %p1527_p0 = scmp.ne.s32.totalorder %s1795_s25, %s1526_s8  ;;  %p1528_p3 = pneg %p1801_p13 }
  0x38   : > { %s1531_s12 = scalar_lea.hbm %s2344_s0, 8192  ;;  %p1532_p9 = scmp.lt.u32.totalorder %s1795_s25, %s2344_s0 }
  0x39   : > { %p1529_p5 = pnand %p1528_p3, %p1527_p0  ;;  %p1533_p1 = scmp.lt.u32.totalorder %s1531_s12, %s1526_s8 }
  0x3a   : > { %p1535_p4 = scmp.lt.u32.totalorder %s1526_s8, %s1795_s25 }
  0x3b   : > { %p1530_p7 = pneg %p1529_p5  ;;  %p1534_p2 = por %p1533_p1, %p1532_p9 }
  0x3d   : > { %p1536_p6 = por %p1535_p4, %p1534_p2 }
  0x3f   : > { %p1537_p8 = pnand %p1536_p6, %p1530_p7 }
  0x41   : > { %1540 = shalt.err (!%p1537_p8)
}
  0x42   : > { %s1541_s7 = scalar_lea.vmem %s1797_s6, 4096  ;;  %s1647_s27 = smov [#allocation2]  }
  0x43   : > { %p1542_p12 = scmp.ne.s32.totalorder %s1797_s6, %s1541_s7  ;;  %s1546_s14 = sshll.u32 %s1647_s27, 4  ;;  %s1547_s14 = int_to_ptr.vmem [resolvable:$false] %s1546_s14 }
  0x44   : > { %s1548_s16 = scalar_lea.vmem %s1547_s14, 8192  ;;  %p1549_p5 = scmp.lt.s32.totalorder %s1797_s6, %s1547_s14 }
  0x45   : > { %p1544_p11 = pnand %p1542_p12, %p1528_p3  ;;  %p1550_p9 = scmp.lt.s32.totalorder %s1548_s16, %s1541_s7 }
  0x47   : > { %p1545_p0 = pneg %p1544_p11  ;;  %p1551_p1 = por %p1550_p9, %p1549_p5 }
  0x49   : > { %p1552_p2 = pnand %p1551_p1, %p1545_p0 }
  0x4b   : > { %1555 = shalt.err (!%p1552_p2)
}
  0x4c   : > { %s1648_s8 = smov 128   ;;  %s1649_s12 = smov 8  }
  0x4d   : > { %1433 = dma.hbm_to_vmem [thread:$0]  (!%p1801_p13), %s1795_s25, 4096, %s1797_s6, %s1805_s11, %s1648_s8, %s1648_s8, %s1649_s12  }
  0x4e   : > { %p2364_p3 = scmp.ne.s32.totalorder %s2358_s30, 0 }
  0x4f   : > { %s1836_s17 = sand.u32 (!%p2364_p3), 1, %s1626_s19   ;;  %p2365_p7 = scmp.ne.s32.totalorder (!%p2364_p3), %s2356_s28, 0 }
  0x50   : > { %255 = sbr.rel (%p2364_p3) target bundleno = 448 (0x1c0), region = 40  ;;  %s1200_s24 = sshll.u32 (!%p2364_p3), %s1836_s17, 8 }
  0x51   : > { %s258_s7 = scalar_lea.sflag (!%p2364_p3), [#allocation3], %s1836_s17  ;;  %s1840_s27 = scalar_lea.vmem (!%p2364_p3), [#allocation2], %s1200_s24 }
  0x57   : > { %1609 = dma.done.wait (%p2365_p7), %s258_s7, 4096  }
  0x58   : > { %1611 = vsyncadd (%p2365_p7), %s258_s7, 4294963200  ;;  %p2366_p13 = scmp.ne.s32.totalorder %s2354_s26, 0 }
  0x5a   : > { %1613 = dma.done.wait (%p2366_p13), [#allocation6], 6144  }
  0x5b   : > { %1615 = vsyncadd (%p2366_p13), [#allocation6], 4294961152  ;;  %v1650_v0 = vmov 0.0   ;;  %v417_v1 = vld [vmem:[#allocation5 + $0x8] sm:$0xff]  ;;  %v420_v2 = vld [vmem:[#allocation5 + $0x20] sm:$0xff]  ;;  %p299_p4 = scmp.lt.s32.totalorder %s1634_s21, 1 }
  0x5c   : > { %545 = vmatprep.mubr.f32.mxu0 %v1650_v0  ;;  %689 = vmatprep.mubr.f32.mxu1 %v1650_v0  ;;  %v416_v3 = vld [vmem:[#allocation5] sm:$0xff]  ;;  %v1336_v4 = vpack.c.bf16 %v420_v2, %v417_v1  ;;  %v419_v5 = vld [vmem:[#allocation5 + $0x18] sm:$0xff]  ;;  %v426_v7 = vld [vmem:[#allocation5 + $0x50] sm:$0xff]  ;;  %s1416_s8 = smul.u32 768, %s1836_s17  ;;  %s1060_s28 = scalar_lea.sflag [#allocation4], %s1836_s17 }
  0x5d   : > { %v423_v6 = vld [vmem:[#allocation5 + $0x38] sm:$0xff]  ;;  %v1338_v8 = vpack.c.bf16 %v419_v5, %v416_v3  ;;  %v422_v10 = vld [vmem:[#allocation5 + $0x30] sm:$0xff]  ;;  %v425_v11 = vld [vmem:[#allocation5 + $0x48] sm:$0xff]  ;;  %s1854_s26 = scalar_select %p299_p4, %s1634_s21, 1 }
  0x5e   : > { %v1340_v9 = vpack.c.bf16 %v426_v7, %v423_v6  ;;  %v429_v12 = vld [vmem:[#allocation5 + $0x68] sm:$0xff]  ;;  %1337 = vmatprep.subr.bf16.mxu0 %v1336_v4  ;;  %1400 = vmatprep.subr.bf16.mxu1 %v1336_v4  ;;  %v432_v13 = vld [vmem:[#allocation5 + $0x80] sm:$0xff]  ;;  %v1342_v14 = vpack.c.bf16 %v425_v11, %v422_v10  ;;  %v431_v17 = vld [vmem:[#allocation5 + $0x78] sm:$0xff]  ;;  %s2094_s12 = scalar_lea.vmem [#allocation7], %s1416_s8  ;;  %s1417_s24 = smul.u32 12288, %s1634_s21 }
  0x5f   : > { %1339 = vmatpush1.bf16.msra.mxu0 %v1338_v8  ;;  %1408 = vmatpush1.bf16.msra.mxu1 %v1338_v8  ;;  %v1344_v15 = vpack.c.bf16 %v432_v13, %v429_v12  ;;  %v428_v16 = vld [vmem:[#allocation5 + $0x60] sm:$0xff]  ;;  %v435_v18 = vld [vmem:[#allocation5 + $0x98] sm:$0xff]  ;;  %v438_v19 = vld [vmem:[#allocation5 + $0xb0] sm:$0xff]  ;;  %s301_s25 = scalar_lea.vmem %s2345_s1, %s1854_s26  ;;  %s304_s11 = scalar_lea.vmem %s2346_s2, %s1854_s26 }
  0x60   : > { %1341 = vmatprep.subr.bf16.mxu0 %v1340_v9  ;;  %1401 = vmatprep.subr.bf16.mxu1 %v1340_v9  ;;  %v1346_v20 = vpack.c.bf16 %v431_v17, %v428_v16  ;;  %v1348_v21 = vpack.c.bf16 %v438_v19, %v435_v18  ;;  %v434_v22 = vld [vmem:[#allocation5 + $0x90] sm:$0xff]  ;;  %v437_v23 = vld [vmem:[#allocation5 + $0xa8] sm:$0xff]  ;;  %v444_v25 = vld [vmem:[#allocation5 + $0xe0] sm:$0xff]  ;;  %s1076_s7 = sshll.u32 %s2094_s12, 4  ;;  %s2287_s26 = scalar_lea.hbm %s2349_s5, %s1417_s24  ;;  %s2289_s7 = int_to_ptr.vmem [resolvable:$true] %s1076_s7 }
  0x61   : > { %v441_v24 = vld [vmem:[#allocation5 + $0xc8] sm:$0xff]  ;;  %v1350_v26 = vpack.c.bf16 %v437_v23, %v434_v22  ;;  %v440_v28 = vld [vmem:[#allocation5 + $0xc0] sm:$0xff]  ;;  %v443_v29 = vld [vmem:[#allocation5 + $0xd8] sm:$0xff]  ;;  %s1556_s30 = scalar_lea.vmem %s2289_s7, 12288 }
  0x62   : > { %v1352_v27 = vpack.c.bf16 %v444_v25, %v441_v24  ;;  %v447_v30 = vld [vmem:[#allocation5 + $0xf8] sm:$0xff]  ;;  %v450_v31 = vld [vmem:[#allocation5 + $0x110] sm:$0xff]  ;;  %v1354_v32 = vpack.c.bf16 %v443_v29, %v440_v28  ;;  %v449_v35 = vld [vmem:[#allocation5 + $0x108] sm:$0xff]  ;;  %p1557_p6 = scmp.ne.s32.totalorder %s2289_s7, %s1556_s30 }
  0x63   : > { %1343 = vmatpush1.bf16.msra.mxu0 %v1342_v14  ;;  %1409 = vmatpush1.bf16.msra.mxu1 %v1342_v14  ;;  %v1356_v33 = vpack.c.bf16 %v450_v31, %v447_v30  ;;  %v446_v34 = vld [vmem:[#allocation5 + $0xf0] sm:$0xff]  ;;  %v453_v36 = vld [vmem:[#allocation5 + $0x128] sm:$0xff]  ;;  %v456_v37 = vld [vmem:[#allocation5 + $0x140] sm:$0xff] }
  0x64   : > { %1345 = vmatprep.subr.bf16.mxu0 %v1344_v15  ;;  %1402 = vmatprep.subr.bf16.mxu1 %v1344_v15  ;;  %v1358_v38 = vpack.c.bf16 %v449_v35, %v446_v34  ;;  %v452_v39 = vld [vmem:[#allocation5 + $0x120] sm:$0xff]  ;;  %v1360_v40 = vpack.c.bf16 %v456_v37, %v453_v36  ;;  %v455_v41 = vld [vmem:[#allocation5 + $0x138] sm:$0xff]  ;;  %v462_v43 = vld [vmem:[#allocation5 + $0x170] sm:$0xff]  ;;  %p1558_p8 = pnand %p1557_p6, %p1780_p10 }
  0x65   : > { %v459_v42 = vld [vmem:[#allocation5 + $0x158] sm:$0xff]  ;;  %v306_v44 = vld [vmem:[%s1840_s27] sm:$0xff]  ;;  %v1362_v47 = vpack.c.bf16 %v455_v41, %v452_v39  ;;  %v458_v48 = vld [vmem:[#allocation5 + $0x150] sm:$0xff] }
  0x66   : > { %v1861_v45 = vld [vmem:[%s301_s25] ss:$0 sm:$0xff]  ;;  %v461_v49 = vld [vmem:[#allocation5 + $0x168] sm:$0xff]  ;;  %v1364_v50 = vpack.c.bf16 %v462_v43, %v459_v42  ;;  %v418_v53 = vld [vmem:[#allocation5 + $0x10] sm:$0xff]  ;;  %p1559_p12 = pneg %p1558_p8  ;;  %s1651_s25 = smov [#allocation7]  }
  0x67   : > { %1347 = vmatpush1.bf16.msra.mxu0 %v1346_v20  ;;  %1410 = vmatpush1.bf16.msra.mxu1 %v1346_v20  ;;  %v330_v46 = vld [vmem:[%s1840_s27 + $0xc0] sm:$0xff]  ;;  %v345_v51 = vmul.f32 %v1861_v45, %v306_v44  ;;  %v421_v54 = vld [vmem:[#allocation5 + $0x28] sm:$0xff]  ;;  %v324_v60 = vld [vmem:[%s1840_s27 + $0x90] sm:$0xff]  ;;  %v1366_v63 = vpack.c.bf16 %v461_v49, %v458_v48  ;;  %s1560_s6 = sshll.u32 %s1651_s25, 4  ;;  %s1561_s6 = int_to_ptr.vmem [resolvable:$false] %s1560_s6 }
  0x68   : > { %1349 = vmatprep.subr.bf16.mxu0 %v1348_v21  ;;  %1403 = vmatprep.subr.bf16.mxu1 %v1348_v21  ;;  %v369_v52 = vmul.f32 %v1861_v45, %v330_v46  ;;  %v323_v55 = vld [vmem:[%s1840_s27 + $0x88] sm:$0xff]  ;;  %v1871_v56 = vld [vmem:[%s304_s11] ss:$0 sm:$0xff]  ;;  %v325_v61 = vld [vmem:[%s1840_s27 + $0x98] sm:$0xff]  ;;  %v1368_v1 = vpack.c.bf16 %v421_v54, %v418_v53  ;;  %v363_v11 = vmul.f32 %v1861_v45, %v324_v60  ;;  %s1562_s10 = scalar_lea.vmem %s1561_s6, 24576  ;;  %p1563_p11 = scmp.lt.s32.totalorder %s2289_s7, %s1561_s6 }
  0x69   : > { %v307_v57 = vld [vmem:[%s1840_s27 + $0x8] sm:$0xff]  ;;  %v362_v59 = vmul.f32 %v1861_v45, %v323_v55  ;;  %v326_v62 = vld [vmem:[%s1840_s27 + $0xa0] sm:$0xff]  ;;  %v328_v3 = vld [vmem:[%s1840_s27 + $0xb0] sm:$0xff]  ;;  %v1883_v5 = vadd.f32 %v1871_v56, %v345_v51  ;;  %v364_v12 = vmul.f32 %v1861_v45, %v325_v61  ;;  %p1564_p0 = scmp.lt.s32.totalorder %s1562_s10, %s1556_s30 }
  0x6a   : > { %v331_v58 = vld [vmem:[%s1840_s27 + $0xc8] sm:$0xff]  ;;  %v329_v4 = vld [vmem:[%s1840_s27 + $0xb8] sm:$0xff]  ;;  %v1886_v6 = vadd.f32 %v1871_v56, %v369_v52  ;;  %v346_v7 = vmul.f32 %v1861_v45, %v307_v57  ;;  %v424_v8 = vld [vmem:[#allocation5 + $0x40] sm:$0xff]  ;;  %v365_v13 = vmul.f32 %v1861_v45, %v326_v62  ;;  %v367_v16 = vmul.f32 %v1861_v45, %v328_v3 }
  0x6b   : > { %1351 = vmatpush1.bf16.msra.mxu0 %v1350_v26  ;;  %1411 = vmatpush1.bf16.msra.mxu1 %v1350_v26  ;;  %v327_v2 = vld [vmem:[%s1840_s27 + $0xa8] sm:$0xff]  ;;  %v427_v9 = vld [vmem:[#allocation5 + $0x58] sm:$0xff]  ;;  %v1890_v10 = vadd.f32 %v1871_v56, %v362_v59  ;;  %v370_v14 = vmul.f32 %v1861_v45, %v331_v58  ;;  %v368_v17 = vmul.f32 %v1861_v45, %v329_v4  ;;  %v308_v18 = vld [vmem:[%s1840_s27 + $0x10] sm:$0xff]  ;;  %p1565_p5 = por %p1564_p0, %p1563_p11 }
  0x6c   : > { %1353 = vmatprep.subr.bf16.mxu0 %v1352_v27  ;;  %1404 = vmatprep.subr.bf16.mxu1 %v1352_v27  ;;  %v366_v15 = vmul.f32 %v1861_v45, %v327_v2  ;;  %v332_v19 = vld [vmem:[%s1840_s27 + $0xd0] sm:$0xff]  ;;  %v1902_v20 = vadd.f32 %v1871_v56, %v363_v11  ;;  %v1905_v21 = vadd.f32 %v1871_v56, %v364_v12  ;;  %v433_v29 = vld [vmem:[#allocation5 + $0x88] sm:$0xff]  ;;  %v333_v34 = vld [vmem:[%s1840_s27 + $0xd8] sm:$0xff] }
  0x6d   : > { %v1908_v22 = vadd.f32 %v1871_v56, %v365_v13  ;;  %v1372_v23 = vpack.c.bf16 %v427_v9, %v424_v8  ;;  %v1914_v25 = vadd.f32 %v1871_v56, %v367_v16  ;;  %v1917_v26 = vadd.f32 %v1871_v56, %v368_v17  ;;  %v430_v28 = vld [vmem:[#allocation5 + $0x70] sm:$0xff]  ;;  %v436_v37 = vld [vmem:[#allocation5 + $0xa0] sm:$0xff]  ;;  %v445_v48 = vld [vmem:[#allocation5 + $0xe8] sm:$0xff]  ;;  %p1566_p9 = pnand %p1565_p5, %p1559_p12 }
  0x6e   : > { %v1911_v24 = vadd.f32 %v1871_v56, %v366_v15  ;;  %v1920_v27 = vadd.f32 %v1871_v56, %v346_v7  ;;  %v1925_v30 = vadd.f32 %v1871_v56, %v370_v14  ;;  %v347_v31 = vmul.f32 %v1861_v45, %v308_v18  ;;  %v310_v42 = vld [vmem:[%s1840_s27 + $0x20] sm:$0xff]  ;;  %v311_v52 = vld [vmem:[%s1840_s27 + $0x28] sm:$0xff]  ;;  %v451_v58 = vld [vmem:[#allocation5 + $0x118] sm:$0xff] }
  0x6f   : > { %1355 = vmatpush1.bf16.msra.mxu0 %v1354_v32  ;;  %1412 = vmatpush1.bf16.msra.mxu1 %v1354_v32  ;;  %v371_v32 = vmul.f32 %v1861_v45, %v332_v19  ;;  %v1376_v35 = vpack.c.bf16 %v433_v29, %v430_v28  ;;  %v372_v41 = vmul.f32 %v1861_v45, %v333_v34  ;;  %v334_v43 = vld [vmem:[%s1840_s27 + $0xe0] sm:$0xff]  ;;  %v335_v53 = vld [vmem:[%s1840_s27 + $0xe8] sm:$0xff]  ;;  %v312_v62 = vld [vmem:[%s1840_s27 + $0x30] sm:$0xff] }
  0x70   : > { %1357 = vmatprep.subr.bf16.mxu0 %v1356_v33  ;;  %1405 = vmatprep.subr.bf16.mxu1 %v1356_v33  ;;  %v309_v33 = vld [vmem:[%s1840_s27 + $0x18] sm:$0xff]  ;;  %v1937_v39 = vadd.f32 %v1871_v56, %v347_v31  ;;  %v373_v51 = vmul.f32 %v1861_v45, %v334_v43  ;;  %v350_v55 = vmul.f32 %v1861_v45, %v311_v52  ;;  %v448_v57 = vld [vmem:[#allocation5 + $0x100] sm:$0xff]  ;;  %v454_v3 = vld [vmem:[#allocation5 + $0x130] sm:$0xff] }
  0x71   : > { %v348_v36 = vmul.f32 %v1861_v45, %v309_v33  ;;  %v1953_v49 = vadd.f32 %v1871_v56, %v372_v41  ;;  %v374_v61 = vmul.f32 %v1861_v45, %v335_v53  ;;  %v457_v4 = vld [vmem:[#allocation5 + $0x148] sm:$0xff]  ;;  %v351_v8 = vmul.f32 %v1861_v45, %v312_v62  ;;  %v313_v11 = vld [vmem:[%s1840_s27 + $0x38] sm:$0xff]  ;;  %v460_v15 = vld [vmem:[#allocation5 + $0x160] sm:$0xff] }
  0x72   : > { %v1968_v60 = vadd.f32 %v1871_v56, %v373_v51  ;;  %v389_v2 = vadd.f32 %v1871_v56, %v350_v55  ;;  %v337_v12 = vld [vmem:[%s1840_s27 + $0xf8] sm:$0xff]  ;;  %v1392_v13 = vpack.c.bf16 %v457_v4, %v454_v3  ;;  %v352_v14 = vmul.f32 %v1861_v45, %v313_v11  ;;  %v315_v33 = vld [vmem:[%s1840_s27 + $0x48] sm:$0xff]  ;;  %v322_v53 = vld [vmem:[%s1840_s27 + $0x80] sm:$0xff] }
  0x73   : > { %1359 = vmatpush1.bf16.msra.mxu0 %v1358_v38  ;;  %1413 = vmatpush1.bf16.msra.mxu1 %v1358_v38  ;;  %v439_v38 = vld [vmem:[#allocation5 + $0xb8] sm:$0xff]  ;;  %v1948_v46 = vadd.f32 %v1871_v56, %v348_v36  ;;  %v1979_v7 = vadd.f32 %v1871_v56, %v374_v61  ;;  %v390_v17 = vadd.f32 %v1871_v56, %v351_v8  ;;  %v316_v36 = vld [vmem:[%s1840_s27 + $0x50] sm:$0xff] }
  0x74   : > { %1361 = vmatprep.subr.bf16.mxu0 %v1360_v40  ;;  %1406 = vmatprep.subr.bf16.mxu1 %v1360_v40  ;;  %v1940_v40 = vadd.f32 %v1871_v56, %v371_v32  ;;  %v1380_v44 = vpack.c.bf16 %v439_v38, %v436_v37  ;;  %v463_v16 = vld [vmem:[#allocation5 + $0x178] sm:$0xff]  ;;  %v376_v19 = vmul.f32 %v1861_v45, %v337_v12 }
  0x75   : > { %v1396_v28 = vpack.c.bf16 %v463_v16, %v460_v15  ;;  %v391_v29 = vadd.f32 %v1871_v56, %v352_v14  ;;  %v355_v38 = vmul.f32 %v1861_v45, %v316_v36  ;;  %v317_v41 = vld [vmem:[%s1840_s27 + $0x58] sm:$0xff] }
  0x76   : > { %v2000_v31 = vadd.f32 %v1871_v56, %v376_v19  ;;  %v321_v52 = vld [vmem:[%s1840_s27 + $0x78] sm:$0xff] }
  0x77   : > { %1363 = vmatpush1.bf16.msra.mxu0 %v1362_v47  ;;  %1414 = vmatpush1.bf16.msra.mxu1 %v1362_v47  ;;  %v442_v47 = vld [vmem:[#allocation5 + $0xd0] sm:$0xff]  ;;  %v360_v55 = vmul.f32 %v1861_v45, %v321_v52 }
  0x78   : > { %1365 = vmatprep.subr.bf16.mxu0 %v1364_v50  ;;  %1407 = vmatprep.subr.bf16.mxu1 %v1364_v50  ;;  %v349_v50 = vmul.f32 %v1861_v45, %v310_v42  ;;  %v1384_v54 = vpack.c.bf16 %v445_v48, %v442_v47  ;;  %v394_v42 = vadd.f32 %v1871_v56, %v355_v38  ;;  %v320_v48 = vld [vmem:[%s1840_s27 + $0x70] sm:$0xff] }
  0x79   : > { %v359_v51 = vmul.f32 %v1861_v45, %v320_v48 }
  0x7a   : > { %v1965_v59 = vadd.f32 %v1871_v56, %v349_v50 }
  0x7b   : > { %1367 = vmatpush1.bf16.msra.mxu0 %v1366_v63  ;;  %1415 = vmatpush1.bf16.msra.mxu1 %v1366_v63  ;;  %v336_v63 = vld [vmem:[%s1840_s27 + $0xf0] sm:$0xff] }
  0x7c   : > { %1369 = vmatprep.subr.bf16.mxu1 %v1368_v1  ;;  %v375_v9 = vmul.f32 %v1861_v45, %v336_v63 }
  0x7e   : > { %546 = vmatmul.mubr.f32.vlgmr.msra.gmra.mrb[0].mxu0 %v1883_v5  ;;  %690 = vmatmul.mubr.f32.vlgmr.msra.gmra.mrb[0].mxu1 %v1886_v6  ;;  %v1991_v18 = vadd.f32 %v1871_v56, %v375_v9 }
  0x7f   : > { %1371 = vmatpush3.bf16.msra.mxu1 %v1368_v1  ;;  %551 = vmatprep.mubr.f32.mxu0 %v1650_v0  ;;  %v1388_v1 = vpack.c.bf16 %v451_v58, %v448_v57  ;;  %v361_v57 = vmul.f32 %v1861_v45, %v322_v53  ;;  %v399_v58 = vadd.f32 %v1871_v56, %v360_v55 }
  0x80   : > { %695 = vmatprep.mubr.f32.mxu1 %v1650_v0  ;;  %1373 = vmatprep.subr.bf16.mxu1 %v1372_v23 }
  0x82   : > { %552 = vmatmul.mubr.f32.gmra.mrb[2].mxu0 %v1920_v27  ;;  %696 = vmatmul.mubr.f32.gmra.mrb[2].mxu1 %v1925_v30 }
  0x83   : > { %1375 = vmatpush3.bf16.msra.mxu1 %v1372_v23  ;;  %557 = vmatprep.mubr.f32.mxu0 %v1650_v0  ;;  %v314_v23 = vld [vmem:[%s1840_s27 + $0x40] sm:$0xff] }
  0x84   : > { %701 = vmatprep.mubr.f32.mxu1 %v1650_v0  ;;  %1377 = vmatprep.subr.bf16.mxu1 %v1376_v35  ;;  %v353_v32 = vmul.f32 %v1861_v45, %v314_v23 }
  0x86   : > { %558 = vmatmul.mubr.f32.gmra.mrb[4].mxu0 %v1937_v39  ;;  %702 = vmatmul.mubr.f32.gmra.mrb[4].mxu1 %v1940_v40  ;;  %v392_v34 = vadd.f32 %v1871_v56, %v353_v32 }
  0x87   : > { %1379 = vmatpush3.bf16.msra.mxu1 %v1376_v35  ;;  %563 = vmatprep.mubr.f32.mxu0 %v1650_v0  ;;  %v354_v35 = vmul.f32 %v1861_v45, %v315_v33 }
  0x88   : > { %707 = vmatprep.mubr.f32.mxu1 %v1650_v0  ;;  %1381 = vmatprep.subr.bf16.mxu1 %v1380_v44 }
  0x89   : > { %v393_v37 = vadd.f32 %v1871_v56, %v354_v35 }
  0x8a   : > { %564 = vmatmul.mubr.f32.gmra.mrb[6].mxu0 %v1948_v46  ;;  %708 = vmatmul.mubr.f32.gmra.mrb[6].mxu1 %v1953_v49 }
  0x8b   : > { %1383 = vmatpush3.bf16.msra.mxu1 %v1380_v44  ;;  %569 = vmatprep.mubr.f32.mxu0 %v1650_v0  ;;  %v319_v44 = vld [vmem:[%s1840_s27 + $0x68] sm:$0xff] }
  0x8c   : > { %713 = vmatprep.mubr.f32.mxu1 %v1650_v0  ;;  %1385 = vmatprep.subr.bf16.mxu1 %v1384_v54  ;;  %v358_v47 = vmul.f32 %v1861_v45, %v319_v44 }
  0x8e   : > { %570 = vmatmul.mubr.f32.gmra.mrb[8].mxu0 %v1965_v59  ;;  %714 = vmatmul.mubr.f32.gmra.mrb[8].mxu1 %v1968_v60  ;;  %v397_v50 = vadd.f32 %v1871_v56, %v358_v47 }
  0x8f   : > { %1387 = vmatpush3.bf16.msra.mxu1 %v1384_v54  ;;  %575 = vmatprep.mubr.f32.mxu0 %v1650_v0  ;;  %v398_v54 = vadd.f32 %v1871_v56, %v359_v51 }
  0x90   : > { %719 = vmatprep.mubr.f32.mxu1 %v1650_v0  ;;  %1389 = vmatprep.subr.bf16.mxu1 %v1388_v1 }
  0x92   : > { %576 = vmatmul.mubr.f32.gmra.mrb[10].mxu0 %v389_v2  ;;  %720 = vmatmul.mubr.f32.gmra.mrb[10].mxu1 %v1979_v7 }
  0x93   : > { %1391 = vmatpush3.bf16.msra.mxu1 %v1388_v1  ;;  %581 = vmatprep.mubr.f32.mxu0 %v1650_v0 }
  0x94   : > { %725 = vmatprep.mubr.f32.mxu1 %v1650_v0  ;;  %1393 = vmatprep.subr.bf16.mxu1 %v1392_v13 }
  0x96   : > { %582 = vmatmul.mubr.f32.gmra.mrb[12].mxu0 %v390_v17  ;;  %726 = vmatmul.mubr.f32.gmra.mrb[12].mxu1 %v1991_v18 }
  0x97   : > { %1395 = vmatpush3.bf16.msra.mxu1 %v1392_v13  ;;  %587 = vmatprep.mubr.f32.mxu0 %v1650_v0 }
  0x98   : > { %731 = vmatprep.mubr.f32.mxu1 %v1650_v0  ;;  %1397 = vmatprep.subr.bf16.mxu1 %v1396_v28 }
  0x9a   : > { %588 = vmatmul.mubr.f32.gmra.mrb[14].mxu0 %v391_v29  ;;  %732 = vmatmul.mubr.f32.gmra.mrb[14].mxu1 %v2000_v31 }
  0x9b   : > { %1399 = vmatpush3.bf16.msra.mxu1 %v1396_v28  ;;  %593 = vmatprep.mubr.f32.mxu0 %v1650_v0 }
  0x9c   : > { %1288 = vmatprep.mubr.f32.mxu1 %v1883_v5  ;;  %v356_v5 = vmul.f32 %v1861_v45, %v317_v41 }
  0x9e   : > { %594 = vmatmul.mubr.f32.gmra.mrb[16].mxu0 %v392_v34  ;;  %1289 = vmatmul.mubr.f32.vlgmr.msra.gmra.mrb[16].mxu1 %v1920_v27  ;;  %v318_v27 = vld [vmem:[%s1840_s27 + $0x60] sm:$0xff]  ;;  %v395_v43 = vadd.f32 %v1871_v56, %v356_v5 }
  0x9f   : > { %599 = vmatprep.mubr.f32.mxu0 %v1650_v0  ;;  %1291 = vmatprep.mubr.f32.mxu1 %v1937_v39  ;;  %v357_v39 = vmul.f32 %v1861_v45, %v318_v27  ;;  %v466_v45 = vlaneseq }
  0xa2   : > { %600 = vmatmul.mubr.f32.gmra.mrb[18].mxu0 %v393_v37  ;;  %1292 = vmatmul.mubr.f32.gmra.mrb[18].mxu1 %v1948_v46  ;;  %v396_v46 = vadd.f32 %v1871_v56, %v357_v39 }
  0xa3   : > { %605 = vmatprep.mubr.f32.mxu0 %v1650_v0  ;;  %1294 = vmatprep.mubr.f32.mxu1 %v1965_v59  ;;  %v400_v59 = vadd.f32 %v1871_v56, %v361_v57  ;;  %v2074_v56 = vshrl.u32 %v466_v45, 7 }
  0xa5   : > { %v476_v57 = vsub.s32 2, %v2074_v56 }
  0xa6   : > { %606 = vmatmul.mubr.f32.gmra.mrb[20].mxu0 %v394_v42  ;;  %1295 = vmatmul.mubr.f32.gmra.mrb[20].mxu1 %v389_v2 }
  0xa7   : > { %611 = vmatprep.mubr.f32.mxu0 %v1650_v0  ;;  %1297 = vmatprep.mubr.f32.mxu1 %v390_v17 }
  0xaa   : > { %612 = vmatmul.mubr.f32.gmra.mrb[22].mxu0 %v395_v43  ;;  %1298 = vmatmul.mubr.f32.gmra.mrb[22].mxu1 %v391_v29 }
  0xab   : > { %617 = vmatprep.mubr.f32.mxu0 %v1650_v0  ;;  %1300 = vmatprep.mubr.f32.mxu1 %v392_v34 }
  0xae   : > { %618 = vmatmul.mubr.f32.gmra.mrb[24].mxu0 %v396_v46  ;;  %1301 = vmatmul.mubr.f32.gmra.mrb[24].mxu1 %v393_v37 }
  0xaf   : > { %623 = vmatprep.mubr.f32.mxu0 %v1650_v0  ;;  %1303 = vmatprep.mubr.f32.mxu1 %v394_v42 }
  0xb2   : > { %624 = vmatmul.mubr.f32.gmra.mrb[26].mxu0 %v397_v50  ;;  %1304 = vmatmul.mubr.f32.gmra.mrb[26].mxu1 %v395_v43 }
  0xb3   : > { %629 = vmatprep.mubr.f32.mxu0 %v1650_v0  ;;  %1306 = vmatprep.mubr.f32.mxu1 %v396_v46 }
  0xb6   : > { %630 = vmatmul.mubr.f32.gmra.mrb[28].mxu0 %v398_v54  ;;  %1307 = vmatmul.mubr.f32.gmra.mrb[28].mxu1 %v397_v50 }
  0xb7   : > { %635 = vmatprep.mubr.f32.mxu0 %v1650_v0  ;;  %1309 = vmatprep.mubr.f32.mxu1 %v398_v54 }
  0xba   : > { %636 = vmatmul.mubr.f32.gmra.mrb[30].mxu0 %v399_v58  ;;  %1310 = vmatmul.mubr.f32.gmra.mrb[30].mxu1 %v399_v58 }
  0xbb   : > { %641 = vmatprep.mubr.f32.mxu0 %v1650_v0  ;;  %1312 = vmatprep.mubr.f32.mxu1 %v400_v59 }
  0xbe   : > { %642 = vmatmul.mubr.f32.gmra.mrb[32].mxu0 %v400_v59  ;;  %1313 = vmatmul.mubr.f32.gmra.mrb[32].mxu1 %v1890_v10 }
  0xbf   : > { %647 = vmatprep.mubr.f32.mxu0 %v1650_v0  ;;  %1315 = vmatprep.mubr.f32.mxu1 %v1902_v20 }
  0xc2   : > { %648 = vmatmul.mubr.f32.gmra.mrb[34].mxu0 %v1890_v10  ;;  %1316 = vmatmul.mubr.f32.gmra.mrb[34].mxu1 %v1905_v21  ;;  %v2080_v10 = vld [vmem:[%s2348_s4] sm:$0x7] }
  0xc3   : > { %653 = vmatprep.mubr.f32.mxu0 %v1650_v0  ;;  %1318 = vmatprep.mubr.f32.mxu1 %v1908_v22 }
  0xc6   : > { %654 = vmatmul.mubr.f32.gmra.mrb[36].mxu0 %v1902_v20  ;;  %1319 = vmatmul.mubr.f32.gmra.mrb[36].mxu1 %v1911_v24  ;;  %v472_v20 = vsub.s32 1, %v2074_v56 }
  0xc7   : > { %659 = vmatprep.mubr.f32.mxu0 %v1650_v0  ;;  %1321 = vmatprep.mubr.f32.mxu1 %v1914_v25 }
  0xca   : > { %660 = vmatmul.mubr.f32.gmra.mrb[38].mxu0 %v1905_v21  ;;  %1322 = vmatmul.mubr.f32.gmra.mrb[38].mxu1 %v1917_v26  ;;  %v2088_v21 = vrot.slane %v2080_v10, %v472_v20 }
  0xcb   : > { %665 = vmatprep.mubr.f32.mxu0 %v1650_v0  ;;  %1324 = vmatprep.mubr.f32.mxu1 %v1886_v6  ;;  %v468_v6 = vsub.s32 0, %v2074_v56 }
  0xce   : > { %666 = vmatmul.mubr.f32.gmra.mrb[40].mxu0 %v1908_v22  ;;  %1325 = vmatmul.mubr.f32.gmra.mrb[40].mxu1 %v1925_v30 }
  0xcf   : > { %671 = vmatprep.mubr.f32.mxu0 %v1650_v0  ;;  %1327 = vmatprep.mubr.f32.mxu1 %v1940_v40 }
  0xd2   : > { %672 = vmatmul.mubr.f32.gmra.mrb[42].mxu0 %v1911_v24  ;;  %1328 = vmatmul.mubr.f32.gmra.mrb[42].mxu1 %v1953_v49 }
  0xd3   : > { %677 = vmatprep.mubr.f32.mxu0 %v1650_v0  ;;  %1330 = vmatprep.mubr.f32.mxu1 %v1968_v60 }
  0xd6   : > { %678 = vmatmul.mubr.f32.gmra.mrb[44].mxu0 %v1914_v25  ;;  %1331 = vmatmul.mubr.f32.gmra.mrb[44].mxu1 %v1979_v7 }
  0xd7   : > { %683 = vmatprep.mubr.f32.mxu0 %v1650_v0  ;;  %1333 = vmatprep.mubr.f32.mxu1 %v1991_v18  ;;  %v2085_v0 = vrot.slane %v2080_v10, %v468_v6 }
  0xda   : > { %684 = vmatmul.mubr.f32.gmra.mrb[46].mxu0 %v1917_v26  ;;  %1334 = vmatmul.mubr.f32.gmra.mrb[46].mxu1 %v2000_v31 }
 0x151   : > { %v547_v22 = vpop.f32.mrb[0].mxu0  ;;  %v691_v24 = vpop.f32.mrb[0].mxu1 }
 0x152   : > { %v548_v25 = vadd.f32 %v547_v22, %v2085_v0  ;;  %v692_v26 = vadd.f32 %v691_v24, %v2085_v0  ;;  %v549_v30 = vpop.f32.mrb[1].mxu0  ;;  %v693_v40 = vpop.f32.mrb[1].mxu1 }
 0x153   : > { %v550_v49 = vadd.f32 %v549_v30, %v2088_v21  ;;  %v694_v60 = vadd.f32 %v693_v40, %v2088_v21 }
 0x154   : > { %963 = vst [vmem:[%s2094_s12] sm:$0xff] %v548_v25  ;;  %1035 = vst [vmem:[%s2094_s12 + $0x240] sm:$0xff] %v692_v26  ;;  %v2152_v25 = vrot.slane %v2080_v10, %v476_v57 }
 0x155   : > { %964 = vst [vmem:[%s2094_s12 + $0x8] sm:$0xff] %v550_v49  ;;  %1036 = vst [vmem:[%s2094_s12 + $0x248] sm:$0xff] %v694_v60  ;;  %v553_v61 = vpop.f32.mrb[2].mxu0  ;;  %v697_v62 = vpop.f32.mrb[2].mxu1 }
 0x156   : > { %v554_v63 = vadd.f32 %v553_v61, %v2085_v0  ;;  %v698_v1 = vadd.f32 %v697_v62, %v2085_v0  ;;  %v555_v2 = vpop.f32.mrb[3].mxu0  ;;  %v699_v3 = vpop.f32.mrb[3].mxu1 }
 0x157   : > { %v556_v4 = vadd.f32 %v555_v2, %v2088_v21  ;;  %v700_v7 = vadd.f32 %v699_v3, %v2088_v21 }
 0x158   : > { %966 = vst [vmem:[%s2094_s12 + $0x18] sm:$0xff] %v554_v63  ;;  %1038 = vst [vmem:[%s2094_s12 + $0x258] sm:$0xff] %v698_v1 }
 0x159   : > { %967 = vst [vmem:[%s2094_s12 + $0x20] sm:$0xff] %v556_v4  ;;  %1039 = vst [vmem:[%s2094_s12 + $0x260] sm:$0xff] %v700_v7  ;;  %v559_v8 = vpop.f32.mrb[4].mxu0  ;;  %v703_v9 = vpop.f32.mrb[4].mxu1 }
 0x15a   : > { %v560_v11 = vadd.f32 %v559_v8, %v2085_v0  ;;  %v704_v12 = vadd.f32 %v703_v9, %v2085_v0  ;;  %v561_v13 = vpop.f32.mrb[5].mxu0  ;;  %v705_v14 = vpop.f32.mrb[5].mxu1 }
 0x15b   : > { %v562_v15 = vadd.f32 %v561_v13, %v2088_v21  ;;  %v706_v16 = vadd.f32 %v705_v14, %v2088_v21 }
 0x15c   : > { %969 = vst [vmem:[%s2094_s12 + $0x30] sm:$0xff] %v560_v11  ;;  %1041 = vst [vmem:[%s2094_s12 + $0x270] sm:$0xff] %v704_v12 }
 0x15d   : > { %970 = vst [vmem:[%s2094_s12 + $0x38] sm:$0xff] %v562_v15  ;;  %1042 = vst [vmem:[%s2094_s12 + $0x278] sm:$0xff] %v706_v16  ;;  %v565_v17 = vpop.f32.mrb[6].mxu0  ;;  %v709_v18 = vpop.f32.mrb[6].mxu1 }
 0x15e   : > { %v566_v19 = vadd.f32 %v565_v17, %v2085_v0  ;;  %v710_v23 = vadd.f32 %v709_v18, %v2085_v0  ;;  %v567_v28 = vpop.f32.mrb[7].mxu0  ;;  %v711_v29 = vpop.f32.mrb[7].mxu1 }
 0x15f   : > { %v568_v31 = vadd.f32 %v567_v28, %v2088_v21  ;;  %v712_v32 = vadd.f32 %v711_v29, %v2088_v21 }
 0x160   : > { %972 = vst [vmem:[%s2094_s12 + $0x48] sm:$0xff] %v566_v19  ;;  %1044 = vst [vmem:[%s2094_s12 + $0x288] sm:$0xff] %v710_v23 }
 0x161   : > { %973 = vst [vmem:[%s2094_s12 + $0x50] sm:$0xff] %v568_v31  ;;  %1045 = vst [vmem:[%s2094_s12 + $0x290] sm:$0xff] %v712_v32  ;;  %v571_v33 = vpop.f32.mrb[8].mxu0  ;;  %v715_v34 = vpop.f32.mrb[8].mxu1 }
 0x162   : > { %v572_v35 = vadd.f32 %v571_v33, %v2085_v0  ;;  %v716_v36 = vadd.f32 %v715_v34, %v2085_v0  ;;  %v573_v37 = vpop.f32.mrb[9].mxu0  ;;  %v717_v38 = vpop.f32.mrb[9].mxu1 }
 0x163   : > { %v574_v41 = vadd.f32 %v573_v37, %v2088_v21  ;;  %v718_v42 = vadd.f32 %v717_v38, %v2088_v21 }
 0x164   : > { %975 = vst [vmem:[%s2094_s12 + $0x60] sm:$0xff] %v572_v35  ;;  %1047 = vst [vmem:[%s2094_s12 + $0x2a0] sm:$0xff] %v716_v36 }
 0x165   : > { %976 = vst [vmem:[%s2094_s12 + $0x68] sm:$0xff] %v574_v41  ;;  %1048 = vst [vmem:[%s2094_s12 + $0x2a8] sm:$0xff] %v718_v42  ;;  %v577_v5 = vpop.f32.mrb[10].mxu0  ;;  %v721_v27 = vpop.f32.mrb[10].mxu1 }
 0x166   : > { %v578_v43 = vadd.f32 %v577_v5, %v2085_v0  ;;  %v722_v39 = vadd.f32 %v721_v27, %v2085_v0  ;;  %v579_v44 = vpop.f32.mrb[11].mxu0  ;;  %v723_v46 = vpop.f32.mrb[11].mxu1 }
 0x167   : > { %v580_v47 = vadd.f32 %v579_v44, %v2088_v21  ;;  %v724_v48 = vadd.f32 %v723_v46, %v2088_v21 }
 0x168   : > { %978 = vst [vmem:[%s2094_s12 + $0x78] sm:$0xff] %v578_v43  ;;  %1050 = vst [vmem:[%s2094_s12 + $0x2b8] sm:$0xff] %v722_v39 }
 0x169   : > { %979 = vst [vmem:[%s2094_s12 + $0x80] sm:$0xff] %v580_v47  ;;  %1051 = vst [vmem:[%s2094_s12 + $0x2c0] sm:$0xff] %v724_v48  ;;  %v583_v50 = vpop.f32.mrb[12].mxu0  ;;  %v727_v51 = vpop.f32.mrb[12].mxu1 }
 0x16a   : > { %v584_v52 = vadd.f32 %v583_v50, %v2085_v0  ;;  %v728_v53 = vadd.f32 %v727_v51, %v2085_v0  ;;  %v585_v54 = vpop.f32.mrb[13].mxu0  ;;  %v729_v55 = vpop.f32.mrb[13].mxu1 }
 0x16b   : > { %v586_v58 = vadd.f32 %v585_v54, %v2088_v21  ;;  %v730_v59 = vadd.f32 %v729_v55, %v2088_v21 }
 0x16c   : > { %981 = vst [vmem:[%s2094_s12 + $0x90] sm:$0xff] %v584_v52  ;;  %1053 = vst [vmem:[%s2094_s12 + $0x2d0] sm:$0xff] %v728_v53 }
 0x16d   : > { %982 = vst [vmem:[%s2094_s12 + $0x98] sm:$0xff] %v586_v58  ;;  %1054 = vst [vmem:[%s2094_s12 + $0x2d8] sm:$0xff] %v730_v59  ;;  %v589_v45 = vpop.f32.mrb[14].mxu0  ;;  %v733_v6 = vpop.f32.mrb[14].mxu1 }
 0x16e   : > { %v590_v20 = vadd.f32 %v589_v45, %v2085_v0  ;;  %v734_v22 = vadd.f32 %v733_v6, %v2085_v0  ;;  %v591_v24 = vpop.f32.mrb[15].mxu0  ;;  %v735_v56 = vpop.f32.mrb[15].mxu1 }
 0x16f   : > { %v592_v26 = vadd.f32 %v591_v24, %v2088_v21  ;;  %v736_v30 = vadd.f32 %v735_v56, %v2088_v21 }
 0x170   : > { %984 = vst [vmem:[%s2094_s12 + $0xa8] sm:$0xff] %v590_v20  ;;  %1056 = vst [vmem:[%s2094_s12 + $0x2e8] sm:$0xff] %v734_v22 }
 0x171   : > { %985 = vst [vmem:[%s2094_s12 + $0xb0] sm:$0xff] %v592_v26  ;;  %1057 = vst [vmem:[%s2094_s12 + $0x2f0] sm:$0xff] %v736_v30  ;;  %v595_v40 = vpop.f32.mrb[16].mxu0  ;;  %v1290_v49 = vpop.f32.mrb[16].mxu1 }
 0x172   : > { %v596_v60 = vadd.f32 %v595_v40, %v2085_v0  ;;  %v810_v61 = vadd.f32 %v1290_v49, %v2152_v25  ;;  %v597_v62 = vpop.f32.mrb[17].mxu0  ;;  %v804_v10 = vpop.f32.mrb[17].mxu1 }
 0x173   : > { %v598_v63 = vadd.f32 %v597_v62, %v2088_v21  ;;  %v805_v1 = vadd.f32 %v804_v10, %v2152_v25 }
 0x174   : > { %987 = vst [vmem:[%s2094_s12 + $0xc0] sm:$0xff] %v596_v60  ;;  %968 = vst [vmem:[%s2094_s12 + $0x28] sm:$0xff] %v810_v61 }
 0x175   : > { %988 = vst [vmem:[%s2094_s12 + $0xc8] sm:$0xff] %v598_v63  ;;  %965 = vst [vmem:[%s2094_s12 + $0x10] sm:$0xff] %v805_v1  ;;  %v601_v2 = vpop.f32.mrb[18].mxu0  ;;  %v1293_v3 = vpop.f32.mrb[18].mxu1 }
 0x176   : > { %v602_v4 = vadd.f32 %v601_v2, %v2085_v0  ;;  %v820_v7 = vadd.f32 %v1293_v3, %v2152_v25  ;;  %v603_v8 = vpop.f32.mrb[19].mxu0  ;;  %v814_v9 = vpop.f32.mrb[19].mxu1 }
 0x177   : > { %v604_v11 = vadd.f32 %v603_v8, %v2088_v21  ;;  %v815_v12 = vadd.f32 %v814_v9, %v2152_v25 }
 0x178   : > { %990 = vst [vmem:[%s2094_s12 + $0xd8] sm:$0xff] %v602_v4  ;;  %974 = vst [vmem:[%s2094_s12 + $0x58] sm:$0xff] %v820_v7 }
 0x179   : > { %991 = vst [vmem:[%s2094_s12 + $0xe0] sm:$0xff] %v604_v11  ;;  %971 = vst [vmem:[%s2094_s12 + $0x40] sm:$0xff] %v815_v12  ;;  %v607_v13 = vpop.f32.mrb[20].mxu0  ;;  %v1296_v14 = vpop.f32.mrb[20].mxu1 }
 0x17a   : > { %v608_v15 = vadd.f32 %v607_v13, %v2085_v0  ;;  %v830_v16 = vadd.f32 %v1296_v14, %v2152_v25  ;;  %v609_v17 = vpop.f32.mrb[21].mxu0  ;;  %v824_v18 = vpop.f32.mrb[21].mxu1 }
 0x17b   : > { %v610_v19 = vadd.f32 %v609_v17, %v2088_v21  ;;  %v825_v23 = vadd.f32 %v824_v18, %v2152_v25 }
 0x17c   : > { %993 = vst [vmem:[%s2094_s12 + $0xf0] sm:$0xff] %v608_v15  ;;  %980 = vst [vmem:[%s2094_s12 + $0x88] sm:$0xff] %v830_v16 }
 0x17d   : > { %994 = vst [vmem:[%s2094_s12 + $0xf8] sm:$0xff] %v610_v19  ;;  %977 = vst [vmem:[%s2094_s12 + $0x70] sm:$0xff] %v825_v23  ;;  %v613_v28 = vpop.f32.mrb[22].mxu0  ;;  %v1299_v29 = vpop.f32.mrb[22].mxu1 }
 0x17e   : > { %v614_v31 = vadd.f32 %v613_v28, %v2085_v0  ;;  %v840_v32 = vadd.f32 %v1299_v29, %v2152_v25  ;;  %v615_v33 = vpop.f32.mrb[23].mxu0  ;;  %v834_v34 = vpop.f32.mrb[23].mxu1 }
 0x17f   : > { %v616_v35 = vadd.f32 %v615_v33, %v2088_v21  ;;  %v835_v36 = vadd.f32 %v834_v34, %v2152_v25 }
 0x180   : > { %996 = vst [vmem:[%s2094_s12 + $0x108] sm:$0xff] %v614_v31  ;;  %986 = vst [vmem:[%s2094_s12 + $0xb8] sm:$0xff] %v840_v32 }
 0x181   : > { %997 = vst [vmem:[%s2094_s12 + $0x110] sm:$0xff] %v616_v35  ;;  %983 = vst [vmem:[%s2094_s12 + $0xa0] sm:$0xff] %v835_v36  ;;  %v619_v37 = vpop.f32.mrb[24].mxu0  ;;  %v1302_v38 = vpop.f32.mrb[24].mxu1 }
 0x182   : > { %v620_v41 = vadd.f32 %v619_v37, %v2085_v0  ;;  %v850_v42 = vadd.f32 %v1302_v38, %v2152_v25  ;;  %v621_v5 = vpop.f32.mrb[25].mxu0  ;;  %v844_v27 = vpop.f32.mrb[25].mxu1 }
 0x183   : > { %v622_v43 = vadd.f32 %v621_v5, %v2088_v21  ;;  %v845_v39 = vadd.f32 %v844_v27, %v2152_v25 }
 0x184   : > { %999 = vst [vmem:[%s2094_s12 + $0x120] sm:$0xff] %v620_v41  ;;  %992 = vst [vmem:[%s2094_s12 + $0xe8] sm:$0xff] %v850_v42 }
 0x185   : > { %1000 = vst [vmem:[%s2094_s12 + $0x128] sm:$0xff] %v622_v43  ;;  %989 = vst [vmem:[%s2094_s12 + $0xd0] sm:$0xff] %v845_v39  ;;  %v625_v44 = vpop.f32.mrb[26].mxu0  ;;  %v1305_v46 = vpop.f32.mrb[26].mxu1 }
 0x186   : > { %v626_v47 = vadd.f32 %v625_v44, %v2085_v0  ;;  %v860_v48 = vadd.f32 %v1305_v46, %v2152_v25  ;;  %v627_v50 = vpop.f32.mrb[27].mxu0  ;;  %v854_v51 = vpop.f32.mrb[27].mxu1 }
 0x187   : > { %v628_v52 = vadd.f32 %v627_v50, %v2088_v21  ;;  %v855_v53 = vadd.f32 %v854_v51, %v2152_v25 }
 0x188   : > { %1002 = vst [vmem:[%s2094_s12 + $0x138] sm:$0xff] %v626_v47  ;;  %998 = vst [vmem:[%s2094_s12 + $0x118] sm:$0xff] %v860_v48 }
 0x189   : > { %1003 = vst [vmem:[%s2094_s12 + $0x140] sm:$0xff] %v628_v52  ;;  %995 = vst [vmem:[%s2094_s12 + $0x100] sm:$0xff] %v855_v53  ;;  %v631_v54 = vpop.f32.mrb[28].mxu0  ;;  %v1308_v55 = vpop.f32.mrb[28].mxu1 }
 0x18a   : > { %v632_v57 = vadd.f32 %v631_v54, %v2085_v0  ;;  %v870_v58 = vadd.f32 %v1308_v55, %v2152_v25  ;;  %v633_v59 = vpop.f32.mrb[29].mxu0  ;;  %v864_v45 = vpop.f32.mrb[29].mxu1 }
 0x18b   : > { %v634_v6 = vadd.f32 %v633_v59, %v2088_v21  ;;  %v865_v20 = vadd.f32 %v864_v45, %v2152_v25 }
 0x18c   : > { %1005 = vst [vmem:[%s2094_s12 + $0x150] sm:$0xff] %v632_v57  ;;  %1004 = vst [vmem:[%s2094_s12 + $0x148] sm:$0xff] %v870_v58 }
 0x18d   : > { %1006 = vst [vmem:[%s2094_s12 + $0x158] sm:$0xff] %v634_v6  ;;  %1001 = vst [vmem:[%s2094_s12 + $0x130] sm:$0xff] %v865_v20  ;;  %v637_v22 = vpop.f32.mrb[30].mxu0  ;;  %v1311_v24 = vpop.f32.mrb[30].mxu1 }
 0x18e   : > { %v638_v56 = vadd.f32 %v637_v22, %v2085_v0  ;;  %v880_v26 = vadd.f32 %v1311_v24, %v2152_v25  ;;  %v639_v30 = vpop.f32.mrb[31].mxu0  ;;  %v874_v40 = vpop.f32.mrb[31].mxu1 }
 0x18f   : > { %v640_v49 = vadd.f32 %v639_v30, %v2088_v21  ;;  %v875_v60 = vadd.f32 %v874_v40, %v2152_v25 }
 0x190   : > { %1008 = vst [vmem:[%s2094_s12 + $0x168] sm:$0xff] %v638_v56  ;;  %1010 = vst [vmem:[%s2094_s12 + $0x178] sm:$0xff] %v880_v26 }
 0x191   : > { %1009 = vst [vmem:[%s2094_s12 + $0x170] sm:$0xff] %v640_v49  ;;  %1007 = vst [vmem:[%s2094_s12 + $0x160] sm:$0xff] %v875_v60  ;;  %v643_v61 = vpop.f32.mrb[32].mxu0  ;;  %v1314_v62 = vpop.f32.mrb[32].mxu1 }
 0x192   : > { %v644_v10 = vadd.f32 %v643_v61, %v2085_v0  ;;  %v890_v63 = vadd.f32 %v1314_v62, %v2152_v25  ;;  %v645_v1 = vpop.f32.mrb[33].mxu0  ;;  %v884_v2 = vpop.f32.mrb[33].mxu1 }
 0x193   : > { %v646_v3 = vadd.f32 %v645_v1, %v2088_v21  ;;  %v885_v4 = vadd.f32 %v884_v2, %v2152_v25 }
 0x194   : > { %1011 = vst [vmem:[%s2094_s12 + $0x180] sm:$0xff] %v644_v10  ;;  %1016 = vst [vmem:[%s2094_s12 + $0x1a8] sm:$0xff] %v890_v63 }
 0x195   : > { %1012 = vst [vmem:[%s2094_s12 + $0x188] sm:$0xff] %v646_v3  ;;  %1013 = vst [vmem:[%s2094_s12 + $0x190] sm:$0xff] %v885_v4  ;;  %v649_v7 = vpop.f32.mrb[34].mxu0  ;;  %v1317_v8 = vpop.f32.mrb[34].mxu1 }
 0x196   : > { %v650_v9 = vadd.f32 %v649_v7, %v2085_v0  ;;  %v900_v11 = vadd.f32 %v1317_v8, %v2152_v25  ;;  %v651_v12 = vpop.f32.mrb[35].mxu0  ;;  %v894_v13 = vpop.f32.mrb[35].mxu1 }
 0x197   : > { %v652_v14 = vadd.f32 %v651_v12, %v2088_v21  ;;  %v895_v15 = vadd.f32 %v894_v13, %v2152_v25 }
 0x198   : > { %1014 = vst [vmem:[%s2094_s12 + $0x198] sm:$0xff] %v650_v9  ;;  %1022 = vst [vmem:[%s2094_s12 + $0x1d8] sm:$0xff] %v900_v11 }
 0x199   : > { %1015 = vst [vmem:[%s2094_s12 + $0x1a0] sm:$0xff] %v652_v14  ;;  %1019 = vst [vmem:[%s2094_s12 + $0x1c0] sm:$0xff] %v895_v15  ;;  %v655_v16 = vpop.f32.mrb[36].mxu0  ;;  %v1320_v17 = vpop.f32.mrb[36].mxu1 }
 0x19a   : > { %v656_v18 = vadd.f32 %v655_v16, %v2085_v0  ;;  %v910_v19 = vadd.f32 %v1320_v17, %v2152_v25  ;;  %v657_v23 = vpop.f32.mrb[37].mxu0  ;;  %v904_v28 = vpop.f32.mrb[37].mxu1 }
 0x19b   : > { %v658_v29 = vadd.f32 %v657_v23, %v2088_v21  ;;  %v905_v31 = vadd.f32 %v904_v28, %v2152_v25 }
 0x19c   : > { %1017 = vst [vmem:[%s2094_s12 + $0x1b0] sm:$0xff] %v656_v18  ;;  %1028 = vst [vmem:[%s2094_s12 + $0x208] sm:$0xff] %v910_v19 }
 0x19d   : > { %1018 = vst [vmem:[%s2094_s12 + $0x1b8] sm:$0xff] %v658_v29  ;;  %1025 = vst [vmem:[%s2094_s12 + $0x1f0] sm:$0xff] %v905_v31  ;;  %v661_v32 = vpop.f32.mrb[38].mxu0  ;;  %v1323_v33 = vpop.f32.mrb[38].mxu1 }
 0x19e   : > { %v662_v34 = vadd.f32 %v661_v32, %v2085_v0  ;;  %v920_v35 = vadd.f32 %v1323_v33, %v2152_v25  ;;  %v663_v36 = vpop.f32.mrb[39].mxu0  ;;  %v914_v37 = vpop.f32.mrb[39].mxu1 }
 0x19f   : > { %v664_v38 = vadd.f32 %v663_v36, %v2088_v21  ;;  %v915_v41 = vadd.f32 %v914_v37, %v2152_v25 }
 0x1a0   : > { %1020 = vst [vmem:[%s2094_s12 + $0x1c8] sm:$0xff] %v662_v34  ;;  %1034 = vst [vmem:[%s2094_s12 + $0x238] sm:$0xff] %v920_v35 }
 0x1a1   : > { %1021 = vst [vmem:[%s2094_s12 + $0x1d0] sm:$0xff] %v664_v38  ;;  %1031 = vst [vmem:[%s2094_s12 + $0x220] sm:$0xff] %v915_v41  ;;  %v667_v42 = vpop.f32.mrb[40].mxu0  ;;  %v1326_v5 = vpop.f32.mrb[40].mxu1 }
 0x1a2   : > { %v668_v27 = vadd.f32 %v667_v42, %v2085_v0  ;;  %v930_v43 = vadd.f32 %v1326_v5, %v2152_v25  ;;  %v669_v39 = vpop.f32.mrb[41].mxu0  ;;  %v924_v44 = vpop.f32.mrb[41].mxu1 }
 0x1a3   : > { %v670_v46 = vadd.f32 %v669_v39, %v2088_v21  ;;  %v925_v47 = vadd.f32 %v924_v44, %v2152_v25 }
 0x1a4   : > { %1023 = vst [vmem:[%s2094_s12 + $0x1e0] sm:$0xff] %v668_v27  ;;  %1040 = vst [vmem:[%s2094_s12 + $0x268] sm:$0xff] %v930_v43 }
 0x1a5   : > { %1024 = vst [vmem:[%s2094_s12 + $0x1e8] sm:$0xff] %v670_v46  ;;  %1037 = vst [vmem:[%s2094_s12 + $0x250] sm:$0xff] %v925_v47  ;;  %v673_v48 = vpop.f32.mrb[42].mxu0  ;;  %v1329_v50 = vpop.f32.mrb[42].mxu1 }
 0x1a6   : > { %v674_v51 = vadd.f32 %v673_v48, %v2085_v0  ;;  %v940_v52 = vadd.f32 %v1329_v50, %v2152_v25  ;;  %v675_v53 = vpop.f32.mrb[43].mxu0  ;;  %v934_v54 = vpop.f32.mrb[43].mxu1 }
 0x1a7   : > { %v676_v55 = vadd.f32 %v675_v53, %v2088_v21  ;;  %v935_v57 = vadd.f32 %v934_v54, %v2152_v25 }
 0x1a8   : > { %1026 = vst [vmem:[%s2094_s12 + $0x1f8] sm:$0xff] %v674_v51  ;;  %1046 = vst [vmem:[%s2094_s12 + $0x298] sm:$0xff] %v940_v52 }
 0x1a9   : > { %1027 = vst [vmem:[%s2094_s12 + $0x200] sm:$0xff] %v676_v55  ;;  %1043 = vst [vmem:[%s2094_s12 + $0x280] sm:$0xff] %v935_v57  ;;  %v679_v58 = vpop.f32.mrb[44].mxu0  ;;  %v1332_v59 = vpop.f32.mrb[44].mxu1 }
 0x1aa   : > { %v680_v45 = vadd.f32 %v679_v58, %v2085_v0  ;;  %v950_v6 = vadd.f32 %v1332_v59, %v2152_v25  ;;  %v681_v20 = vpop.f32.mrb[45].mxu0  ;;  %v944_v22 = vpop.f32.mrb[45].mxu1 }
 0x1ab   : > { %v682_v24 = vadd.f32 %v681_v20, %v2088_v21  ;;  %v945_v56 = vadd.f32 %v944_v22, %v2152_v25 }
 0x1ac   : > { %1029 = vst [vmem:[%s2094_s12 + $0x210] sm:$0xff] %v680_v45  ;;  %1052 = vst [vmem:[%s2094_s12 + $0x2c8] sm:$0xff] %v950_v6 }
 0x1ad   : > { %1030 = vst [vmem:[%s2094_s12 + $0x218] sm:$0xff] %v682_v24  ;;  %1049 = vst [vmem:[%s2094_s12 + $0x2b0] sm:$0xff] %v945_v56  ;;  %v685_v26 = vpop.f32.mrb[46].mxu0  ;;  %v1335_v30 = vpop.f32.mrb[46].mxu1 }
 0x1ae   : > { %v686_v40 = vadd.f32 %v685_v26, %v2085_v0  ;;  %v960_v49 = vadd.f32 %v1335_v30, %v2152_v25  ;;  %v687_v60 = vpop.f32.mrb[47].mxu0  ;;  %v954_v61 = vpop.f32.mrb[47].mxu1 }
 0x1af   : > { %v688_v62 = vadd.f32 %v687_v60, %v2088_v21  ;;  %v955_v10 = vadd.f32 %v954_v61, %v2152_v25 }
 0x1b0   : > { %1032 = vst [vmem:[%s2094_s12 + $0x228] sm:$0xff] %v686_v40  ;;  %1058 = vst [vmem:[%s2094_s12 + $0x2f8] sm:$0xff] %v960_v49 }
 0x1b1   : > { %1033 = vst [vmem:[%s2094_s12 + $0x230] sm:$0xff] %v688_v62  ;;  %1055 = vst [vmem:[%s2094_s12 + $0x2e0] sm:$0xff] %v955_v10 }
 0x1b2   : > { %1569 = shalt.err (!%p1566_p9)
}
 0x1b3   : > { %s1570_s11 = scalar_lea.hbm %s2287_s26, 12288  ;;  %s1574_s8 = scalar_lea.hbm %s2349_s5, 24576 }
 0x1b4   : > { %p1571_p1 = scmp.ne.s32.totalorder %s2287_s26, %s1570_s11  ;;  %p1575_p7 = scmp.lt.u32.totalorder %s2287_s26, %s2349_s5 }
 0x1b5   : > { %p1576_p13 = scmp.lt.u32.totalorder %s1574_s8, %s1570_s11  ;;  %p1578_p6 = scmp.lt.u32.totalorder %s1570_s11, %s2287_s26 }
 0x1b6   : > { %p1572_p2 = pnand %p1571_p1, %p1780_p10 }
 0x1b7   : > { %p1577_p4 = por %p1576_p13, %p1575_p7 }
 0x1b8   : > { %p1573_p3 = pneg %p1572_p2 }
 0x1b9   : > { %p1579_p8 = por %p1578_p6, %p1577_p4 }
 0x1bb   : > { %p1580_p12 = pnand %p1579_p8, %p1573_p3 }
 0x1bd   : > { %1583 = shalt.err (!%p1580_p12)
}
 0x1be   : > { %s1652_s21 = smov 384   ;;  %s1653_s27 = smov 24  }
 0x1bf   : > { %1424 = dma.vmem_to_hbm [thread:$0]  (%p1780_p10), %s2289_s7, 12288, %s2287_s26, %s1060_s28, %s1652_s21, %s1652_s21, %s1653_s27  }
 0x1c0 PF: > { %s1091_s30 = sand.u32 1, %s1622_s18   ;;  %p2367_p11 = scmp.ne.s32.totalorder %s2357_s29, 0 }
 0x1c1   : > { %p2368_p0 = scmp.ge.s32.totalorder %s1642_s23, 2  ;;  %s1092_s25 = scalar_lea.sflag [#allocation4], %s1091_s30 }
 0x1c3   : > { %p1435_p5 = pnand %p2368_p0, %p2367_p11 }
 0x1c5   : > { %1617 = dma.done.wait (!%p1435_p5), %s1092_s25, 12288  }
 0x1c6   : > { %1619 = vsyncadd (!%p1435_p5), %s1092_s25, 4294955008  ;;  %s22_s23 = sadd.s32 1, %s1642_s23   ;;  %s2369_s18 = smov %s1626_s19 }
 0x1c7   : > { %p19_p9 = scmp.ge.s32.totalorder %s22_s23, 4   ;;  %s2370_s19 = smov %s1630_s20 }
 0x1c8   : > { %s2371_s20 = smov %s1789_s15  ;;  %s2372_s21 = smov %s1638_s22 }
 0x1c9   : > { %s2373_s22 = smov %s2375_s9  ;;  %21 = sbr.rel (!%p19_p9) target bundleno = 7 (0x7), region = 95 }
 0x1d0   :  { %1097 = vsyncpa [#allocation3], 1 }
 0x1d1   :  { %1099 = vsyncpa [#allocation3 + $0x1], 1 }
 0x1d2   :  { %1100 = vsyncpa [#allocation6], 1 }
 0x1d3   :  { %1101 = vsyncpa [#allocation4], 1 }
 0x1d4   :  { %1103 = vsyncpa [#allocation4 + $0x1], 1 }

</bundles_post_ra>
